<compile_context>
chip_gen: v7x
topology: tpu7x:2x2x1
jax: 0.10.0
libtpu: 0.0.40
codegen_flags: <defaults>
</compile_context>

<pallas_src>
import math
import jax
import jax.numpy as jnp
from jax.experimental import pallas as pl
from jax.experimental.pallas import tpu as pltpu


def _cdiv(a, b):
    return (a + b - 1) // b


def _round_up(x, m):
    return ((x + m - 1) // m) * m


# -----------------------------------------------------------------------------
# Kernels
# -----------------------------------------------------------------------------
def _dense_kernel(w_ref, b_ref, x_ref, o_ref):
    # w_ref: (C_out, C_in)   fused weight (comp [+ residual]) -- resident
    # b_ref: (C_out, 1)      fused bias (f32)                 -- resident
    # x_ref: (1, C_in, TP)   pixel tile of one batch element (native dtype)
    # o_ref: (1, C_out, TP)  output tile (lane-dense)
    x = x_ref[0].astype(w_ref.dtype)                 # in-kernel cast (no HBM pass)
    acc = jnp.dot(w_ref[...], x, preferred_element_type=jnp.float32)
    acc = acc + b_ref[...]
    o_ref[0] = jnp.maximum(acc, 0.0).astype(o_ref.dtype)


def _grouped_kernel(wg_ref, b_ref, x_ref, o_ref):
    # Grouped comp conv; the identity residual is pre-folded into wg.
    # wg_ref: (G, cog, cig), b_ref: (C_out, 1), x_ref: (1, C_in, TP)
    G, cog, cig = wg_ref.shape
    x = x_ref[0].astype(wg_ref.dtype)
    for g in range(G):                               # static unroll: G MXU calls
        xg = x[g * cig:(g + 1) * cig, :]
        acc = jnp.dot(wg_ref[g], xg, preferred_element_type=jnp.float32)
        acc = acc + b_ref[pl.ds(g * cog, cog), :]
        o_ref[0, pl.ds(g * cog, cog), :] = jnp.maximum(acc, 0.0).astype(o_ref.dtype)


def _grouped_proj_kernel(wg_ref, wr_ref, b_ref, x_ref, o_ref):
    # Grouped comp conv + dense 1x1 projection residual.
    G, cog, cig = wg_ref.shape
    x = x_ref[0].astype(wg_ref.dtype)
    resid = jnp.dot(wr_ref[...], x, preferred_element_type=jnp.float32) + b_ref[...]
    for g in range(G):
        xg = x[g * cig:(g + 1) * cig, :]
        acc = jnp.dot(wg_ref[g], xg, preferred_element_type=jnp.float32)
        acc = acc + resid[g * cog:(g + 1) * cog, :]
        o_ref[0, pl.ds(g * cog, cog), :] = jnp.maximum(acc, 0.0).astype(o_ref.dtype)


# -----------------------------------------------------------------------------
# Wrapper
# -----------------------------------------------------------------------------
def resnext_block_forward(x_nchw, w_comp, b_comp, w_down=None, b_down=None, *,
                          groups=1, compute_dtype=jnp.bfloat16, out_dtype=None,
                          tile_p_max=4096, group_k_threshold=128):
    """Fused ResNeXtBlock forward.

    x_nchw : (N, C_in, H, W) activations, native dtype (not pre-cast)
    w_comp : (C_out, C_in // groups) grouped 1x1 comp-conv weight (PyTorch conv
             weight with the trailing 1x1 squeezed)
    b_comp : (C_out,)
    w_down : (C_out, C_in) 1x1 projection weight, or None -> identity residual
    b_down : (C_out,) or None
    returns: (N, C_out, H, W) in out_dtype (default: x's dtype).
    """
    N, C_in, H, W = x_nchw.shape
    C_out = w_comp.shape[0]
    cig, cog = C_in // groups, C_out // groups
    assert w_comp.shape == (C_out, cig)
    if w_down is None:
        assert C_out == C_in, "identity residual requires C_out == C_in"
    out_dtype = x_nchw.dtype if out_dtype is None else out_dtype

    HW = H * W
    x3 = x_nchw.reshape(N, C_in, HW)                 # free reshape, native dtype

    # ---- weight preparation (residual folded where possible) ---------------
    b_sum = b_comp.astype(jnp.float32)
    if b_down is not None:
        b_sum = b_sum + b_down.astype(jnp.float32)
    b_sum = b_sum.reshape(C_out, 1)

    wg = w_comp.reshape(groups, cog, cig)
    use_grouped = groups > 1 and cig >= group_k_threshold

    if use_grouped:
        if w_down is None:
            # identity is block-diagonal too -> fold it into the group blocks
            wg = wg + jnp.eye(cig, dtype=wg.dtype)[None]
            weights = (wg.astype(compute_dtype),)
            kernel = _grouped_kernel
            w_flops = C_out * cig
        else:
            weights = (wg.astype(compute_dtype), w_down.astype(compute_dtype))
            kernel = _grouped_proj_kernel
            w_flops = C_out * cig + C_out * C_in
    else:
        # dense block-diagonal expansion; residual folded in -> ONE matmul
        w_dense = jnp.zeros((C_out, C_in), jnp.float32)
        for g in range(groups):
            w_dense = w_dense.at[g * cog:(g + 1) * cog,
                                 g * cig:(g + 1) * cig].set(wg[g].astype(jnp.float32))
        if w_down is None:
            w_dense = w_dense + jnp.eye(C_in, dtype=jnp.float32)
        else:
            w_dense = w_dense + w_down.astype(jnp.float32)
        weights = (w_dense.astype(compute_dtype),)
        kernel = _dense_kernel
        w_flops = C_out * C_in
    # TODO(synk): for very large C_in (>= ~2048) add a third "arbitrary" K grid
    # axis with a VMEM f32 accumulator instead of keeping the contraction whole.

    # ---- VMEM budget & pixel-tile choice ------------------------------------
    x_b = jnp.dtype(x3.dtype).itemsize
    o_b = jnp.dtype(out_dtype).itemsize
    c_b = jnp.dtype(compute_dtype).itemsize
    w_bytes = sum(int(w.size) * c_b for w in weights)

    try:
        vmem_cap = int(pltpu.get_tpu_info().vmem_capacity_bytes)
    except Exception:
        vmem_cap = 64 << 20                           # conservative (v7x per-TC)
    vmem_usable = (vmem_cap * 3) // 4                 # 96 MiB on 128 MiB parts, 48 on v7x

    # per pixel-column: double-buffered x & out tiles, in-kernel bf16 copy of x,
    # plus the f32 matmul intermediates (2 of them on the grouped+projection path).
    n_interm = 2 if kernel is _grouped_proj_kernel else 1
    per_col = (2 * C_in * x_b + C_in * c_b + 2 * C_out * o_b
               + (n_interm + 1) * C_out * 4)
    fixed = 2 * w_bytes + 2 * C_out * 4 + (2 << 20)   # dbl-buffered weights/bias + slack

    budget_cols = (vmem_usable - fixed) // per_col
    cap = max(128, min(tile_p_max, (budget_cols // 128) * 128))

    n_tiles = _cdiv(HW, cap)
    if N * n_tiles < 2 and HW > 128:
        n_tiles = 2                                   # keep both v7x TCs busy
    if n_tiles <= 1:
        tp = HW                                       # block == full dim: no pad, no waste
    else:
        tp = min(_round_up(_cdiv(HW, n_tiles), 128), _round_up(HW, 128))
    n_tiles = _cdiv(HW, tp)

    vmem_limit = int(min(vmem_usable, max(fixed + per_col * tp + (2 << 20), 32 << 20)))

    # ---- cost estimate (lets XLA overlap neighbours with this call) --------
    flops = 2 * N * HW * w_flops + 2 * N * HW * C_out
    bytes_accessed = (int(x3.size) * x_b + w_bytes + C_out * 4
                      + N * C_out * HW * o_b)
    cost = pl.CostEstimate(flops=int(flops), transcendentals=0,
                           bytes_accessed=int(bytes_accessed))

    # ---- specs --------------------------------------------------------------
    in_specs = []
    for w in weights:                                  # resident weights
        in_specs.append(pl.BlockSpec(w.shape, lambda n, p, _nd=w.ndim: (0,) * _nd))
    in_specs.append(pl.BlockSpec((C_out, 1), lambda n, p: (0, 0)))        # bias
    in_specs.append(pl.BlockSpec((1, C_in, tp), lambda n, p: (n, 0, p)))  # x tile
    out_spec = pl.BlockSpec((1, C_out, tp), lambda n, p: (n, 0, p))

    out = pl.pallas_call(
        kernel,
        out_shape=jax.ShapeDtypeStruct((N, C_out, HW), out_dtype),
        grid_spec=pltpu.PrefetchScalarGridSpec(
            num_scalar_prefetch=0,
            grid=(N, n_tiles),
            in_specs=in_specs,
            out_specs=out_spec,
        ),
        compiler_params=pltpu.CompilerParams(
            dimension_semantics=("parallel", "parallel"),
            vmem_limit_bytes=vmem_limit,
        ),
        cost_estimate=cost,
    )(*weights, b_sum, x3)

    return out.reshape(N, C_out, H, W)


# -----------------------------------------------------------------------------
# Pure-JAX reference (true f32 module semantics)
# -----------------------------------------------------------------------------
def _reference_forward(x, w_comp, b_comp, groups, w_down, b_down):
    N, C_in, H, W = x.shape
    C_out = w_comp.shape[0]
    cig, cog = C_in // groups, C_out // groups
    wg = w_comp.reshape(groups, cog, cig).astype(jnp.float32)
    w_dense = jnp.zeros((C_out, C_in), jnp.float32)
    for g in range(groups):
        w_dense = w_dense.at[g * cog:(g + 1) * cog, g * cig:(g + 1) * cig].set(wg[g])
    xf = x.astype(jnp.float32)
    out = (jnp.einsum('oc,nchw->nohw', w_dense, xf)
           + b_comp.astype(jnp.float32)[None, :, None, None])
    if w_down is None:
        resid = xf
    else:
        resid = jnp.einsum('oc,nchw->nohw', w_down.astype(jnp.float32), xf)
        if b_down is not None:
            resid = resid + b_down.astype(jnp.float32)[None, :, None, None]
    return jnp.maximum(out + resid, 0.0)


if __name__ == "__main__":
    # TODO(synk): comp_block is None in the PyTorch base-class __init__; it is
    # instantiated here as the ResNeXt grouped 1x1 conv and `downsample` as a
    # 1x1 projection conv (the signature ops this block wraps).
    key = jax.random.PRNGKey(0)
    k = jax.random.split(key, 12)

    def check(name, x, w_comp, b_comp, groups, w_down, b_down):
        out = resnext_block_forward(x, w_comp, b_comp, w_down, b_down, groups=groups)
        out = jax.block_until_ready(out)
        ref = _reference_forward(x, w_comp, b_comp, groups, w_down, b_down)
        assert out.shape == ref.shape, (name, out.shape, ref.shape)
        assert jnp.allclose(out.astype(jnp.float32), ref, atol=5e-2, rtol=5e-2), name

    # --- A: small channels (dense-fold path) + projection downsample --------
    N, C_in, C_out, G, H, W = 2, 8, 16, 2, 16, 16
    x = jax.random.normal(k[0], (N, C_in, H, W), jnp.float32)
    w_comp = jax.random.normal(k[1], (C_out, C_in // G), jnp.float32) / math.sqrt(C_in // G)
    b_comp = jax.random.normal(k[2], (C_out,), jnp.float32) * 0.01
    w_down = jax.random.normal(k[3], (C_out, C_in), jnp.float32) / math.sqrt(C_in)
    b_down = jax.random.normal(k[4], (C_out,), jnp.float32) * 0.01
    check("dense+proj", x, w_comp, b_comp, G, w_down, b_down)

    # --- B: identity residual, ragged 14x14 map (no pad / no slice needed) ---
    N, C, G, H, W = 2, 16, 2, 14, 14
    x = jax.random.normal(k[5], (N, C, H, W), jnp.float32)
    w_comp = jax.random.normal(k[6], (C, C // G), jnp.float32) / math.sqrt(C // G)
    b_comp = jax.random.normal(k[7], (C,), jnp.float32) * 0.01
    check("dense+identity", x, w_comp, b_comp, G, None, None)

    # --- C: wide per-group channels -> grouped MXU path + projection resid ---
    N, C_in, C_out, G, H, W = 1, 256, 256, 2, 16, 16
    x = jax.random.normal(k[8], (N, C_in, H, W), jnp.float32)
    w_comp = jax.random.normal(k[9], (C_out, C_in // G), jnp.float32) / math.sqrt(C_in // G)
    b_comp = jax.random.normal(k[10], (C_out,), jnp.float32) * 0.01
    w_down = jax.random.normal(k[11], (C_out, C_in), jnp.float32) / math.sqrt(C_in)
    b_down = jnp.zeros((C_out,), jnp.float32)
    check("grouped+proj", x, w_comp, b_comp, G, w_down, b_down)

    # --- D: grouped path with identity residual folded into the group blocks -
    check("grouped+identity", x, w_comp, b_comp, G, None, None)

    print("KERNEL_OK")
</pallas_src>

<mosaic_0001>
module attributes {stable_mosaic.version = 11 : i64} {
  func.func @_dense_kernel(%arg0: i32, %arg1: i32, %arg2: memref<16x8xbf16, #tpu.memory_space<vmem>>, %arg3: memref<16x1xf32, #tpu.memory_space<vmem>>, %arg4: memref<1x8x256xf32, #tpu.memory_space<vmem>>, %arg5: memref<1x16x256xf32, #tpu.memory_space<vmem>>) attributes {dimension_semantics = [#tpu.dimension_semantics<parallel>, #tpu.dimension_semantics<parallel>], iteration_bounds = array<i64: 2, 1>, scalar_prefetch = 0 : i64, scratch_operands = 0 : i64, tpu.core_type = #tpu.core_type<tc>, window_params = [{pipeline_mode = #tpu.pipeline_mode<synchronous>, transform_indices = @transform_0, window_bounds = array<i64: 16, 8>}, {pipeline_mode = #tpu.pipeline_mode<synchronous>, transform_indices = @transform_1, window_bounds = array<i64: 16, 1>}, {transform_indices = @transform_2, window_bounds = array<i64: 1, 8, 256>}, {transform_indices = @transform_3, window_bounds = array<i64: 1, 16, 256>}]} {
    %c0 = arith.constant 0 : index
    %c0_0 = arith.constant 0 : index
    %c0_1 = arith.constant 0 : index
    %0 = vector.load %arg4[%c0, %c0_0, %c0_1] : memref<1x8x256xf32, #tpu.memory_space<vmem>>, vector<1x8x256xf32>
    %1 = vector.shape_cast %0 : vector<1x8x256xf32> to vector<8x256xf32>
    %2 = arith.truncf %1 : vector<8x256xf32> to vector<8x256xbf16>
    %c0_2 = arith.constant 0 : index
    %c0_3 = arith.constant 0 : index
    %3 = vector.load %arg2[%c0_2, %c0_3] : memref<16x8xbf16, #tpu.memory_space<vmem>>, vector<16x8xbf16>
    %cst = arith.constant dense<0.000000e+00> : vector<16x256xf32>
    %4 = tpu.matmul %3, %2, %cst {dimension_numbers = #tpu.dot_dimension_numbers<[1], [0], [0], [1], [0, 0, 1, 1], [], []>} : vector<16x8xbf16>, vector<8x256xbf16>, vector<16x256xf32> -> vector<16x256xf32>
    %c0_4 = arith.constant 0 : index
    %c0_5 = arith.constant 0 : index
    %5 = vector.load %arg3[%c0_4, %c0_5] : memref<16x1xf32, #tpu.memory_space<vmem>>, vector<16x1xf32>
    %6 = vector.broadcast %5 : vector<16x1xf32> to vector<16x256xf32>
    %7 = arith.addf %4, %6 : vector<16x256xf32>
    %cst_6 = arith.constant 0.000000e+00 : f32
    %8 = vector.broadcast %cst_6 : f32 to vector<16x256xf32>
    %9 = arith.maximumf %7, %8 : vector<16x256xf32>
    %c0_7 = arith.constant 0 : index
    %c0_8 = arith.constant 0 : index
    %c0_9 = arith.constant 0 : index
    %10 = vector.load %arg5[%c0_7, %c0_8, %c0_9] : memref<1x16x256xf32, #tpu.memory_space<vmem>>, vector<1x16x256xf32>
    %11 = vector.shape_cast %10 : vector<1x16x256xf32> to vector<16x256xf32>
    %12 = vector.shape_cast %9 : vector<16x256xf32> to vector<1x16x256xf32>
    tpu.vector_store %arg5[%c0_7, %c0_8, %c0_9], %12 {strides = array<i32>} : memref<1x16x256xf32, #tpu.memory_space<vmem>>, vector<1x16x256xf32>,
    return
  }
  func.func @transform_0(%arg0: i32, %arg1: i32) -> (i32, i32) {
    %c0_i32 = arith.constant 0 : i32
    %c0_i32_0 = arith.constant 0 : i32
    %c0_i32_1 = arith.constant 0 : i32
    return %c0_i32, %c0_i32_0 : i32, i32
  }
  func.func @transform_1(%arg0: i32, %arg1: i32) -> (i32, i32) {
    %c0_i32 = arith.constant 0 : i32
    %c0_i32_0 = arith.constant 0 : i32
    %c0_i32_1 = arith.constant 0 : i32
    return %c0_i32, %c0_i32_0 : i32, i32
  }
  func.func @transform_2(%arg0: i32, %arg1: i32) -> (i32, i32, i32) {
    %c0_i32 = arith.constant 0 : i32
    %c0_i32_0 = arith.constant 0 : i32
    return %arg0, %c0_i32, %arg1 : i32, i32, i32
  }
  func.func @transform_3(%arg0: i32, %arg1: i32) -> (i32, i32, i32) {
    %c0_i32 = arith.constant 0 : i32
    %c0_i32_0 = arith.constant 0 : i32
    return %arg0, %c0_i32, %arg1 : i32, i32, i32
  }
}

</mosaic_0001>

<bundles_post_ra>
// kernel: tpu_custom_call.1
= control target key start
LH: loop header
LB: loop body
LE: loop exit
PB: predicated region body
PF: predicated region fallthrough
CT: control target
= control target key end

     0   :  { %8 = vsyncpa [#allocation3], 0  ;;  %s687_s0 = inlined_call_operand.vmem [shape: bf16[16,8], index: 0, kind: input, shape index: {}]   ;;  %s688_s1 = inlined_call_operand.vmem [shape: f32[16,1], index: 1, kind: input, shape index: {}]   ;;  %s689_s2 = inlined_call_operand.vmem [shape: f32[2,8,256], index: 2, kind: input, shape index: {}]   ;;  %s690_s3 = inlined_call_operand.hbm [shape: f32[2,16,256], index: 3, kind: output, shape index: {}]  }
   0x1   :  { %10 = vsyncpa [#allocation3 + $0x1], 0  ;;  %s563_s12 = smov 0   ;;  %s565_s13 = smov 0  }
   0x2   :  { %s567_s14 = smov 0   ;;  %s569_s15 = smov 0  }
   0x3   :  { %s571_s16 = smov 0   ;;  %s573_s17 = smov 0  }
   0x4 LB: > { %s381_s18 = sadd.s32 4294967295, %s537_s17   ;;  %s382_s19 = sadd.s32 4294967294, %s537_s17   ;;  %s537_s17 = sphi %s573_s17, %s16_s17   ;;  %s533_s16 = sphi %s571_s16, %s697_s16   ;;  %s529_s15 = sphi %s569_s15, %s696_s15   ;;  %s525_s14 = sphi %s567_s14, %s695_s14   ;;  %s521_s13 = sphi %s565_s13, %s694_s13   ;;  %s517_s12 = sphi %s563_s12, %s693_s12  }
   0x5   : > { %s28_s20 = sadd.s32 1, %s533_s16  ;;  %s107_s21 = sadd.s32 1, %s525_s14 }
   0x6   : > { %p30_p0 = scmp.ge.s32.totalorder %s28_s20, 2  ;;  %p117_p1 = scmp.ne.s32.totalorder %s525_s14, %s521_s13 }
   0x7   : > { %p118_p2 = scmp.eq.s32.totalorder %s381_s18, 1  ;;  %p123_p3 = scmp.ne.s32.totalorder %s521_s13, %s517_s12 }
   0x8   : > { %s699_s20 = smov (%p30_p0, %s28_s20), 0  ;;  %p124_p5 = scmp.eq.s32.totalorder %s382_s19, 1 }
   0x9   : > { %p603_p4 = por %p118_p2, %p117_p1  ;;  %s102_s23 = ssub.s32 %s533_s16, %s699_s20 }
   0xa   : > { %p385_p6 = scmp.ge.s32.totalorder %s537_s17, 1  ;;  %p105_p7 = scmp.eq.s32.totalorder %s102_s23, 0 }
   0xb   : > { %p610_p8 = por %p124_p5, %p123_p3  ;;  %p161_p9 = scmp.lt.s32.totalorder %s537_s17, 3 }
   0xc   : > { %s616_s25 = scalar_select %p105_p7, %s525_s14, %s107_s21  }
   0xd   : > { %p162_p10 = pnand %p385_p6, %p161_p9 }
   0xe   : > { %p190_p11 = scmp.lt.s32.totalorder (!%p162_p10), %s529_s15, 1  ;;  %v539_v0 = vmov (!%p162_p10), 0   ;;  %v207_v1 = vld [vmem:[%s688_s1] sm:$0xff] (!%p162_p10)  ;;  %v208_v2 = vld [vmem:[%s688_s1 + $0x8] sm:$0xff] (!%p162_p10)  ;;  %vm228_vm0 = vcmask (!%p162_p10), 1043456   ;;  %vm224_vm1 = vcmask (!%p162_p10), 64512  }
   0xf   : > { %165 = sbr.rel (%p162_p10) target bundleno = 267 (0x10b), region = 32  ;;  %267 = vmatprep.mubr.bf16.mxu0 (!%p162_p10), %v539_v0  ;;  %457 = vset.pattern.permute.xlu0 (!%p162_p10), %v539_v0  ;;  %v458_v8 = vld [vmem:[%s687_s0] sm:$0xff] (!%p162_p10)   ;;  %s186_s10 = sand.u32 (!%p162_p10), 1, %s521_s13  }
  0x10   : > { %211 = vperm.xlu0 (!%p162_p10), %457, %v207_v1   ;;  %s386_s11 = sshll.u32 (!%p162_p10), %s186_s10, 5  ;;  %s398_s21 = sshll.u32 (!%p162_p10), %s529_s15, 9 }
  0x11   : > { %s188_s18 = scalar_lea.vmem (!%p162_p10), [#allocation2], %s386_s11  ;;  %s639_s27 = scalar_lea.hbm (!%p162_p10), %s690_s3, %s398_s21 }
  0x12   : > { %s302_s19 = sshll.u32 (!%p162_p10), %s188_s18, 4  ;;  %s540_s29 = smov (!%p162_p10), [#allocation2]   ;;  %s634_s19 = int_to_ptr.vmem [resolvable:$true] %s302_s19 }
  0x13   : > { %s463_s30 = sshll.u32 (!%p162_p10), %s540_s29, 4  ;;  %s464_s30 = int_to_ptr.vmem [resolvable:$false] %s463_s30 }
  0x14   : > { %216 = vperm.xlu0 (!%p162_p10), %457, %v208_v2   ;;  %p466_p1 = scmp.lt.s32.totalorder (!%p162_p10), %s634_s19, %s464_s30 }
  0x16   : > { %s191_s28 = scalar_select %p190_p11, %s529_s15, 1 }
  0x17   : > { %s641_s15 = scalar_lea.sflag [#allocation3], %s186_s10 }
  0x18   : > { %s397_s4 = sshll.u32 %s191_s28, 4  ;;  %s459_s28 = scalar_lea.vmem %s634_s19, 512 }
  0x19   : > { %s197_s7 = scalar_lea.vmem %s689_s2, %s397_s4  ;;  %p460_p12 = scmp.ne.s32.totalorder %s634_s19, %s459_s28 }
  0x1a   : > { %v202_v3 = vld [vmem:[%s197_s7 + $0x8] sm:$0xff]  ;;  %v201_v4 = vld [vmem:[%s197_s7] sm:$0xff]  ;;  %s465_s4 = scalar_lea.vmem %s464_s30, 1024 }
  0x1b   : > { %v204_v5 = vpack.c.bf16 %v202_v3, %v202_v3  ;;  %v203_v6 = vpack.c.bf16 %v201_v4, %v201_v4  ;;  %p461_p13 = pnand %p460_p12, %p603_p4  ;;  %p467_p2 = scmp.lt.s32.totalorder %s465_s4, %s459_s28 }
  0x1d   : > { %390 = vmatprep.subr.msk.bf16.mxu0 %vm228_vm0, %v204_v5  ;;  %v230_v7 = vsel %vm228_vm0, %v203_v6, 0  ;;  %p462_p0 = pneg %p461_p13  ;;  %p468_p3 = por %p467_p2, %p466_p1 }
  0x1e   : > { %236 = vmatpush1.bf16.msra.mxu0 %v230_v7 }
  0x1f   : > { %p469_p5 = pnand %p468_p3, %p462_p0 }
  0x21   : > { %391 = vmatmul.mubr.msk.bf16.vlgmr.msra.gmra.mrb[0].mxu0 %vm224_vm1, %v458_v8 }
  0x8f   : > { %v212_v9 = vpop.permute.xlu0 %211 }
  0x93   : > { %v217_v13 = vpop.permute.xlu0 %216 }
  0xf4   : > { %v269_v10 = vpop.f32.mrb[0].mxu0 }
  0xf5   : > { %v270_v11 = vadd.f32 %v269_v10, %v212_v9  ;;  %v271_v12 = vpop.f32.mrb[1].mxu0 }
  0xf6   : > { %v272_v14 = vadd.f32 %v271_v12, %v212_v9  ;;  %v273_v15 = vpop.f32.mrb[2].mxu0 }
  0xf7   : > { %v278_v16 = vmax.f32 %v270_v11, 0.0  ;;  %v274_v17 = vadd.f32 %v273_v15, %v217_v13  ;;  %v275_v18 = vpop.f32.mrb[3].mxu0 }
  0xf8   : > { %v279_v19 = vmax.f32 %v272_v14, 0.0  ;;  %v276_v20 = vadd.f32 %v275_v18, %v217_v13 }
  0xf9   : > { %282 = vst [vmem:[%s188_s18] sm:$0xff] %v278_v16  ;;  %v280_v21 = vmax.f32 %v274_v17, 0.0 }
  0xfa   : > { %283 = vst [vmem:[%s188_s18 + $0x8] sm:$0xff] %v279_v19  ;;  %v281_v22 = vmax.f32 %v276_v20, 0.0 }
  0xfb   : > { %284 = vst [vmem:[%s188_s18 + $0x10] sm:$0xff] %v280_v21 }
  0xfc   : > { %285 = vst [vmem:[%s188_s18 + $0x18] sm:$0xff] %v281_v22 }
  0xfd   : > { %472 = shalt.err (!%p469_p5)
}
  0xfe   : > { %s473_s5 = scalar_lea.hbm %s639_s27, 512  ;;  %s477_s8 = scalar_lea.hbm %s690_s3, 1024 }
  0xff   : > { %p474_p6 = scmp.ne.s32.totalorder %s639_s27, %s473_s5  ;;  %p478_p10 = scmp.lt.u32.totalorder %s639_s27, %s690_s3 }
 0x100   : > { %p479_p11 = scmp.lt.u32.totalorder %s477_s8, %s473_s5  ;;  %p481_p13 = scmp.lt.u32.totalorder %s473_s5, %s639_s27 }
 0x101   : > { %p475_p7 = pnand %p474_p6, %p603_p4 }
 0x102   : > { %p480_p12 = por %p479_p11, %p478_p10 }
 0x103   : > { %p476_p9 = pneg %p475_p7 }
 0x104   : > { %p482_p0 = por %p481_p13, %p480_p12 }
 0x106   : > { %p483_p1 = pnand %p482_p0, %p476_p9 }
 0x108   : > { %486 = shalt.err (!%p483_p1)
}
 0x109   : > { %s541_s11 = smov 256   ;;  %s542_s18 = smov 16  }
 0x10a   : > { %399 = dma.vmem_to_hbm [thread:$0]  (%p603_p4), %s634_s19, 512, %s639_s27, %s641_s15, %s541_s11, %s541_s11, %s542_s18  }
 0x10b PF: > { %p405_p2 = scmp.ge.s32.totalorder %s537_s17, 2  ;;  %s317_s21 = sand.u32 1, %s517_s12  }
 0x10c   : > { %s318_s23 = scalar_lea.sflag [#allocation3], %s317_s21 }
 0x10d   : > { %p402_p3 = pnand %p405_p2, %p610_p8 }
 0x10f   : > { %512 = dma.done.wait (!%p402_p3), %s318_s23, 512  }
 0x110   : > { %514 = vsyncadd (!%p402_p3), %s318_s23, 4294966784  ;;  %s16_s17 = sadd.s32 1, %s537_s17   ;;  %s693_s12 = smov %s521_s13 }
 0x111   : > { %p13_p5 = scmp.ge.s32.totalorder %s16_s17, 4   ;;  %s694_s13 = smov %s525_s14 }
 0x112   : > { %s695_s14 = smov %s616_s25  ;;  %s696_s15 = smov %s533_s16 }
 0x113   : > { %s697_s16 = smov %s699_s20  ;;  %15 = sbr.rel (!%p13_p5) target bundleno = 4 (0x4), region = 67 }
 0x11a   :  { %323 = vsyncpa [#allocation3], 1 }
 0x11b   :  { %325 = vsyncpa [#allocation3 + $0x1], 1 }

</bundles_post_ra>
